<compile_context>
chip_gen: v6e
topology: v6e:2x2x1
jax: 0.10.0
libtpu: 0.0.40
codegen_flags: <defaults>
</compile_context>

<pallas_src>
import functools

import jax
import jax.numpy as jnp
from jax.experimental import pallas as pl
from jax.experimental.pallas import tpu as pltpu


# -----------------------------------------------------------------------------
# Pallas kernel: T-step SCN-LSTM, weights VMEM-resident, h/c carried in scratch.
# -----------------------------------------------------------------------------
def scn_lstm_seq_kernel(xin_ref, h0_ref, c0_ref,
                        wproj_ref, bproj_ref, whc_ref, bhc_ref, wg_ref, bg_ref,
                        h_seq_ref, c_out_ref, h_scr, c_scr,
                        *, rnn_size, concept_size, input_size):
    R = rnn_size
    C = concept_size
    E = input_size
    f32 = jnp.float32
    t = pl.program_id(0)

    # Initialize the recurrent state from the provided h0/c0 on the first step.
    @pl.when(t == 0)
    def _():
        h_scr[...] = h0_ref[...].astype(f32)
        c_scr[...] = c0_ref[...].astype(f32)

    xin = xin_ref[...].astype(f32)           # (B, C+E+2R) = [s | xt | h_att | vt]
    h_prev = h_scr[...]                      # (B, R)
    c_prev = c_scr[...]                      # (B, R)

    sx = xin[:, :C + E]                      # (B, C+E)   = [s | xt]
    h_att_vt = xin[:, C + E:]                # (B, 2R)    = [h_att | vt]

    # --- Projection stage (2 MXU matmuls: streamed input + recurrence). ---
    # proj columns: [W_ib,W_fb,W_ob,W_cb | U_ib,U_fb,U_ob,U_cb](s) | [W_ic,W_fc,W_oc,W_cc](xt)
    proj = jnp.dot(sx, wproj_ref[...].astype(f32),
                   preferred_element_type=f32) + bproj_ref[...]            # (B, 12R)
    s_proj = proj[:, :8 * R]                                               # (B, 8R)
    x_proj = proj[:, 8 * R:]                                               # (B, 4R)
    # h_proj columns: [U_ic, U_fc, U_oc, U_cc](h_prev)
    h_proj = jnp.dot(h_prev, whc_ref[...].astype(f32),
                     preferred_element_type=f32) + bhc_ref[...]            # (B, 4R)

    # gate_lo = [xit, xft, xot, xct | hit, hft, hot, hct]   (one full-vreg VPU mul)
    gate_lo = s_proj * jnp.concatenate([x_proj, h_proj], axis=1)           # (B, 8R)
    gate_full = jnp.concatenate([gate_lo, h_att_vt], axis=1)               # (B, 10R)

    # --- Gate stage: single fused matmul against block-diag/stacked W_{i,f,o,c}. ---
    pre = jnp.dot(gate_full, wg_ref[...].astype(f32),
                  preferred_element_type=f32) + bg_ref[...]                # (B, 4R)
    gates = jax.nn.sigmoid(pre)   # sigmoid also on the candidate (matches PyTorch ref)

    it = gates[:, 0 * R:1 * R]
    ft = gates[:, 1 * R:2 * R]
    ot = gates[:, 2 * R:3 * R]
    cc = gates[:, 3 * R:4 * R]

    c_new = it * cc + ft * c_prev
    h_new = ot * jnp.tanh(c_new)

    h_scr[...] = h_new
    c_scr[...] = c_new
    h_seq_ref[...] = h_new.astype(h_seq_ref.dtype)
    # c_out is a resident output block (same index every step); final value wins.
    c_out_ref[...] = c_new.astype(c_out_ref.dtype)


# -----------------------------------------------------------------------------
# Wrappers
# -----------------------------------------------------------------------------
def scn_lstm_sequence(xs, vs, ss, h_atts, h0, c0, params):
    """Run T steps of the SCN-LSTM cell inside a single pallas_call.

    xs: (T,B,E), vs: (T,B,R), ss: (T,B,C), h_atts: (T,B,R), h0/c0: (B,R).
    Returns (h_seq (T,B,R), c_last (B,R)).
    """
    T, B, E = xs.shape
    R = h0.shape[1]
    C = ss.shape[-1]
    # Pack all per-step activations into one lane-dense streamed slab.
    xin = jnp.concatenate([ss, xs, h_atts, vs], axis=-1)   # (T, B, C+E+2R)
    Din = xin.shape[-1]

    kernel = functools.partial(scn_lstm_seq_kernel,
                               rnn_size=R, concept_size=C, input_size=E)
    resident = lambda t: (0, 0)   # weights / state blocks stay VMEM-resident across t

    h_seq, c_last = pl.pallas_call(
        kernel,
        grid=(T,),
        out_shape=(jax.ShapeDtypeStruct((T, B, R), jnp.float32),
                   jax.ShapeDtypeStruct((B, R), jnp.float32)),
        in_specs=[
            pl.BlockSpec((None, B, Din), lambda t: (t, 0, 0)),      # per-step activations
            pl.BlockSpec((B, R), resident),                          # h0
            pl.BlockSpec((B, R), resident),                          # c0
            pl.BlockSpec(params["w_proj"].shape, resident),          # (C+E, 12R)
            pl.BlockSpec(params["b_proj"].shape, resident),          # (1, 12R)
            pl.BlockSpec(params["whc"].shape, resident),             # (R, 4R)
            pl.BlockSpec(params["bhc"].shape, resident),             # (1, 4R)
            pl.BlockSpec(params["wg"].shape, resident),              # (10R, 4R)
            pl.BlockSpec(params["bg"].shape, resident),              # (1, 4R)
        ],
        out_specs=(
            pl.BlockSpec((None, B, R), lambda t: (t, 0, 0)),         # h per step
            pl.BlockSpec((B, R), resident),                          # final c
        ),
        scratch_shapes=[pltpu.VMEM((B, R), jnp.float32),             # h carry
                        pltpu.VMEM((B, R), jnp.float32)],            # c carry
        compiler_params=pltpu.CompilerParams(
            dimension_semantics=("arbitrary",)),                     # recurrence over time
    )(xin, h0, c0, params["w_proj"], params["b_proj"], params["whc"],
      params["bhc"], params["wg"], params["bg"])
    return h_seq, c_last


def scn_lstm(xt, vt, s, h_prev, c_prev, h_att, params):
    """Single-step forward with the exact PyTorch SCN_LSTM.forward signature."""
    h_seq, c_last = scn_lstm_sequence(xt[None], vt[None], s[None], h_att[None],
                                      h_prev, c_prev, params)
    return h_seq[0], c_last


# -----------------------------------------------------------------------------
# Parameter init (mimics nn.Linear U(-1/sqrt(fan_in), 1/sqrt(fan_in))) and packing
# into the fused, lane-dense kernel weights.
# -----------------------------------------------------------------------------
def _linear(key, fan_in, fan_out):
    kw, kb = jax.random.split(key)
    bound = 1.0 / jnp.sqrt(fan_in)
    w = jax.random.uniform(kw, (fan_out, fan_in), jnp.float32, -bound, bound)  # (out, in)
    b = jax.random.uniform(kb, (fan_out,), jnp.float32, -bound, bound)
    return w, b


def pack_params(lin, C, E, R, weight_dtype=jnp.bfloat16):
    def T_(n):   # (in, out)
        return lin[n][0].T

    def b_(n):
        return lin[n][1]

    # s-projection columns: [W_ib,W_fb,W_ob,W_cb | U_ib,U_fb,U_ob,U_cb]
    s_order = ["W_ib", "W_fb", "W_ob", "W_cb", "U_ib", "U_fb", "U_ob", "U_cb"]
    wsb = jnp.concatenate([T_(n) for n in s_order], axis=1)                # (C, 8R)
    bsb = jnp.concatenate([b_(n) for n in s_order])                        # (8R,)

    x_order = ["W_ic", "W_fc", "W_oc", "W_cc"]
    wxc = jnp.concatenate([T_(n) for n in x_order], axis=1)                # (E, 4R)
    bxc = jnp.concatenate([b_(n) for n in x_order])                        # (4R,)

    # Fused projection weight acting on [s | xt]: (C+E, 12R), zero off-blocks.
    w_proj = jnp.zeros((C + E, 12 * R), jnp.float32)
    w_proj = w_proj.at[:C, :8 * R].set(wsb)
    w_proj = w_proj.at[C:, 8 * R:].set(wxc)
    b_proj = jnp.concatenate([bsb, bxc]).reshape(1, 12 * R)

    h_order = ["U_ic", "U_fc", "U_oc", "U_cc"]
    whc = jnp.concatenate([T_(n) for n in h_order], axis=1)                # (R, 4R)
    bhc = jnp.concatenate([b_(n) for n in h_order]).reshape(1, 4 * R)

    # Fused gate weight acting on [gate_x(4R) | gate_h(4R) | h_att(R) | vt(R)]: (10R, 4R).
    # NOTE: the two block-diagonal sections are 75% zeros; fine at R=32 (latency-bound),
    # revisit for R >= 128 where the wasted MACs/VMEM start to matter.
    g_order = ["W_i", "W_f", "W_o", "W_c"]
    wg = jnp.zeros((10 * R, 4 * R), jnp.float32)
    for g, name in enumerate(g_order):
        w = T_(name)                                                       # (4R, R)
        col = slice(g * R, (g + 1) * R)
        wg = wg.at[g * R:(g + 1) * R, col].set(w[0 * R:1 * R, :])          # x-side (block diag)
        wg = wg.at[4 * R + g * R:4 * R + (g + 1) * R, col].set(w[1 * R:2 * R, :])  # h-side
        wg = wg.at[8 * R:9 * R, col].set(w[2 * R:3 * R, :])                # h_att (stacked)
        wg = wg.at[9 * R:10 * R, col].set(w[3 * R:4 * R, :])               # vt (stacked)
    bg = jnp.concatenate([b_(n) for n in g_order]).reshape(1, 4 * R)

    return dict(w_proj=w_proj.astype(weight_dtype), b_proj=b_proj,
                whc=whc.astype(weight_dtype), bhc=bhc,
                wg=wg.astype(weight_dtype), bg=bg)


def init_params(key, concept_size, input_encoding_size, rnn_size,
                weight_dtype=jnp.bfloat16):
    C, E, R = concept_size, input_encoding_size, rnn_size
    names = ["W_ib", "W_ic", "U_ib", "U_ic",
             "W_fb", "W_fc", "U_fb", "U_fc",
             "W_ob", "W_oc", "U_ob", "U_oc",
             "W_cb", "W_cc", "U_cb", "U_cc",
             "W_i", "W_f", "W_o", "W_c"]
    keys = jax.random.split(key, len(names))
    lin = {}
    for k, name in zip(keys, names):
        if name in ("W_i", "W_f", "W_o", "W_c"):
            lin[name] = _linear(k, 4 * R, R)
        elif name.endswith("b"):
            lin[name] = _linear(k, C, R)
        elif name.startswith("W") and name.endswith("c"):
            lin[name] = _linear(k, E, R)
        else:  # U_*c : rnn_size -> rnn_size
            lin[name] = _linear(k, R, R)
    return pack_params(lin, C, E, R, weight_dtype), lin


# -----------------------------------------------------------------------------
# Pure-JAX reference (mirrors the PyTorch forward exactly) for validation.
# -----------------------------------------------------------------------------
def reference_step(xt, vt, s, h_prev, c_prev, h_att, lin):
    def ap(n, x):
        w, b = lin[n]
        return jnp.dot(x, w.T, preferred_element_type=jnp.float32) + b

    xit = ap("W_ib", s) * ap("W_ic", xt)
    hit = ap("U_ib", s) * ap("U_ic", h_prev)
    xft = ap("W_fb", s) * ap("W_fc", xt)
    hft = ap("U_fb", s) * ap("U_fc", h_prev)
    xot = ap("W_ob", s) * ap("W_oc", xt)
    hot = ap("U_ob", s) * ap("U_oc", h_prev)
    xct = ap("W_cb", s) * ap("W_cc", xt)
    hct = ap("U_cb", s) * ap("U_cc", h_prev)

    i_in = jnp.concatenate([xit, hit, h_att, vt], axis=1)
    f_in = jnp.concatenate([xft, hft, h_att, vt], axis=1)
    o_in = jnp.concatenate([xot, hot, h_att, vt], axis=1)
    c_in = jnp.concatenate([xct, hct, h_att, vt], axis=1)

    it = jax.nn.sigmoid(ap("W_i", i_in))
    ft = jax.nn.sigmoid(ap("W_f", f_in))
    ot = jax.nn.sigmoid(ap("W_o", o_in))
    ct = jax.nn.sigmoid(ap("W_c", c_in))
    ct = it * ct + ft * c_prev
    ht = ot * jnp.tanh(ct)
    return ht, ct


if __name__ == "__main__":
    B = 8                      # batch
    C = 16                     # opt.concept_size
    E = 24                     # opt.input_encoding_size
    R = 32                     # opt.rnn_size
    T = 6                      # sequence length for the in-kernel time loop

    key = jax.random.PRNGKey(0)
    kp, kx, kv, ks, kh, kc, ka = jax.random.split(key, 7)

    params_bf16, lin = init_params(kp, C, E, R, weight_dtype=jnp.bfloat16)
    params_f32 = pack_params(lin, C, E, R, weight_dtype=jnp.float32)

    xs     = jax.random.normal(kx, (T, B, E), jnp.float32)
    vs     = jax.random.normal(kv, (T, B, R), jnp.float32)
    ss     = jax.random.normal(ks, (T, B, C), jnp.float32)
    h_atts = jax.random.normal(ka, (T, B, R), jnp.float32)
    h0     = jax.random.normal(kh, (B, R), jnp.float32)
    c0     = jax.random.normal(kc, (B, R), jnp.float32)

    # 1) Single step, f32 packed weights: tight tolerance so packing/ordering bugs
    #    (which produce O(1) errors) cannot hide.
    ht, ct = scn_lstm(xs[0], vs[0], ss[0], h0, c0, h_atts[0], params_f32)
    jax.block_until_ready((ht, ct))
    ht_ref, ct_ref = reference_step(xs[0], vs[0], ss[0], h0, c0, h_atts[0], lin)
    assert ht.shape == (B, R) and ct.shape == (B, R)
    assert jnp.allclose(ht, ht_ref, atol=3e-5, rtol=1e-5), "single-step ht mismatch (f32)"
    assert jnp.allclose(ct, ct_ref, atol=3e-5, rtol=1e-5), "single-step ct mismatch (f32)"

    # 2) T-step sequence (in-kernel time loop), f32 packed weights.
    h_seq, c_last = scn_lstm_sequence(xs, vs, ss, h_atts, h0, c0, params_f32)
    jax.block_until_ready((h_seq, c_last))
    h_r, c_r, h_seq_ref = h0, c0, []
    for t in range(T):
        h_r, c_r = reference_step(xs[t], vs[t], ss[t], h_r, c_r, h_atts[t], lin)
        h_seq_ref.append(h_r)
    h_seq_ref = jnp.stack(h_seq_ref)
    assert jnp.allclose(h_seq, h_seq_ref, atol=1e-4, rtol=1e-4), "sequence h mismatch (f32)"
    assert jnp.allclose(c_last, c_r, atol=1e-4, rtol=1e-4), "sequence c mismatch (f32)"

    # 3) Single step with bf16-stored weights (production dtype; halves weight DMA).
    ht_b, ct_b = scn_lstm(xs[0], vs[0], ss[0], h0, c0, h_atts[0], params_bf16)
    jax.block_until_ready((ht_b, ct_b))
    assert jnp.allclose(ht_b, ht_ref, atol=3e-2, rtol=3e-2), "single-step ht mismatch (bf16)"
    assert jnp.allclose(ct_b, ct_ref, atol=3e-2, rtol=3e-2), "single-step ct mismatch (bf16)"

    print("KERNEL_OK")
</pallas_src>

<mosaic_0001>
module attributes {stable_mosaic.version = 11 : i64} {
  func.func @scn_lstm_seq_kernel(%arg0: i32, %arg1: memref<1x8x104xf32, #tpu.memory_space<vmem>>, %arg2: memref<8x32xf32, #tpu.memory_space<vmem>>, %arg3: memref<8x32xf32, #tpu.memory_space<vmem>>, %arg4: memref<40x384xf32, #tpu.memory_space<vmem>>, %arg5: memref<1x384xf32, #tpu.memory_space<vmem>>, %arg6: memref<32x128xf32, #tpu.memory_space<vmem>>, %arg7: memref<1x128xf32, #tpu.memory_space<vmem>>, %arg8: memref<320x128xf32, #tpu.memory_space<vmem>>, %arg9: memref<1x128xf32, #tpu.memory_space<vmem>>, %arg10: memref<1x8x32xf32, #tpu.memory_space<vmem>>, %arg11: memref<8x32xf32, #tpu.memory_space<vmem>>, %arg12: memref<8x32xf32, #tpu.memory_space<vmem>>, %arg13: memref<8x32xf32, #tpu.memory_space<vmem>>) attributes {dimension_semantics = [#tpu.dimension_semantics<arbitrary>], iteration_bounds = array<i64: 1>, scalar_prefetch = 0 : i64, scratch_operands = 2 : i64, tpu.core_type = #tpu.core_type<tc>, window_params = [{transform_indices = @transform_0, window_bounds = array<i64: 1, 8, 104>}, {pipeline_mode = #tpu.pipeline_mode<synchronous>, transform_indices = @transform_1, window_bounds = array<i64: 8, 32>}, {pipeline_mode = #tpu.pipeline_mode<synchronous>, transform_indices = @transform_2, window_bounds = array<i64: 8, 32>}, {pipeline_mode = #tpu.pipeline_mode<synchronous>, transform_indices = @transform_3, window_bounds = array<i64: 40, 384>}, {pipeline_mode = #tpu.pipeline_mode<synchronous>, transform_indices = @transform_4, window_bounds = array<i64: 1, 384>}, {pipeline_mode = #tpu.pipeline_mode<synchronous>, transform_indices = @transform_5, window_bounds = array<i64: 32, 128>}, {pipeline_mode = #tpu.pipeline_mode<synchronous>, transform_indices = @transform_6, window_bounds = array<i64: 1, 128>}, {pipeline_mode = #tpu.pipeline_mode<synchronous>, transform_indices = @transform_7, window_bounds = array<i64: 320, 128>}, {pipeline_mode = #tpu.pipeline_mode<synchronous>, transform_indices = @transform_8, window_bounds = array<i64: 1, 128>}, {transform_indices = @transform_9, window_bounds = array<i64: 1, 8, 32>}, {pipeline_mode = #tpu.pipeline_mode<synchronous>, transform_indices = @transform_10, window_bounds = array<i64: 8, 32>}]} {
    %c0_i32 = arith.constant 0 : i32
    %0 = arith.cmpi eq, %arg0, %c0_i32 : i32
    %1 = arith.extui %0 : i1 to i32
    %c0_i32_0 = arith.constant 0 : i32
    %2 = arith.cmpi ne, %1, %c0_i32_0 : i32
    scf.if %2 {
      %c0_31 = arith.constant 0 : index
      %c0_32 = arith.constant 0 : index
      %49 = vector.load %arg2[%c0_31, %c0_32] : memref<8x32xf32, #tpu.memory_space<vmem>>, vector<8x32xf32>
      %c0_33 = arith.constant 0 : index
      %c0_34 = arith.constant 0 : index
      %50 = vector.load %arg12[%c0_33, %c0_34] : memref<8x32xf32, #tpu.memory_space<vmem>>, vector<8x32xf32>
      tpu.vector_store %arg12[%c0_33, %c0_34], %49 {strides = array<i32>} : memref<8x32xf32, #tpu.memory_space<vmem>>, vector<8x32xf32>,
      %c0_35 = arith.constant 0 : index
      %c0_36 = arith.constant 0 : index
      %51 = vector.load %arg3[%c0_35, %c0_36] : memref<8x32xf32, #tpu.memory_space<vmem>>, vector<8x32xf32>
      %c0_37 = arith.constant 0 : index
      %c0_38 = arith.constant 0 : index
      %52 = vector.load %arg13[%c0_37, %c0_38] : memref<8x32xf32, #tpu.memory_space<vmem>>, vector<8x32xf32>
      tpu.vector_store %arg13[%c0_37, %c0_38], %51 {strides = array<i32>} : memref<8x32xf32, #tpu.memory_space<vmem>>, vector<8x32xf32>,
    } else {
    }
    %c0 = arith.constant 0 : index
    %c0_1 = arith.constant 0 : index
    %c0_2 = arith.constant 0 : index
    %3 = vector.load %arg1[%c0, %c0_1, %c0_2] : memref<1x8x104xf32, #tpu.memory_space<vmem>>, vector<1x8x104xf32>
    %4 = vector.shape_cast %3 : vector<1x8x104xf32> to vector<8x104xf32>
    %c0_3 = arith.constant 0 : index
    %c0_4 = arith.constant 0 : index
    %5 = vector.load %arg12[%c0_3, %c0_4] : memref<8x32xf32, #tpu.memory_space<vmem>>, vector<8x32xf32>
    %c0_5 = arith.constant 0 : index
    %c0_6 = arith.constant 0 : index
    %6 = vector.load %arg13[%c0_5, %c0_6] : memref<8x32xf32, #tpu.memory_space<vmem>>, vector<8x32xf32>
    %7 = vector.extract_strided_slice %4 {offsets = [0, 0], sizes = [8, 40], strides = [1, 1]} : vector<8x104xf32> to vector<8x40xf32>
    %8 = vector.extract_strided_slice %4 {offsets = [0, 40], sizes = [8, 64], strides = [1, 1]} : vector<8x104xf32> to vector<8x64xf32>
    %c0_7 = arith.constant 0 : index
    %c0_8 = arith.constant 0 : index
    %9 = vector.load %arg4[%c0_7, %c0_8] : memref<40x384xf32, #tpu.memory_space<vmem>>, vector<40x384xf32>
    %cst = arith.constant dense<0.000000e+00> : vector<8x384xf32>
    %10 = tpu.matmul %7, %9, %cst {dimension_numbers = #tpu.dot_dimension_numbers<[1], [0], [0], [1], [0, 0, 1, 1], [], []>} : vector<8x40xf32>, vector<40x384xf32>, vector<8x384xf32> -> vector<8x384xf32>
    %c0_9 = arith.constant 0 : index
    %c0_10 = arith.constant 0 : index
    %11 = vector.load %arg5[%c0_9, %c0_10] : memref<1x384xf32, #tpu.memory_space<vmem>>, vector<1x384xf32>
    %12 = vector.broadcast %11 : vector<1x384xf32> to vector<8x384xf32>
    %13 = arith.addf %10, %12 : vector<8x384xf32>
    %14 = vector.extract_strided_slice %13 {offsets = [0, 0], sizes = [8, 256], strides = [1, 1]} : vector<8x384xf32> to vector<8x256xf32>
    %15 = vector.extract_strided_slice %13 {offsets = [0, 256], sizes = [8, 128], strides = [1, 1]} : vector<8x384xf32> to vector<8x128xf32>
    %c0_11 = arith.constant 0 : index
    %c0_12 = arith.constant 0 : index
    %16 = vector.load %arg6[%c0_11, %c0_12] : memref<32x128xf32, #tpu.memory_space<vmem>>, vector<32x128xf32>
    %cst_13 = arith.constant dense<0.000000e+00> : vector<8x128xf32>
    %17 = tpu.matmul %5, %16, %cst_13 {dimension_numbers = #tpu.dot_dimension_numbers<[1], [0], [0], [1], [0, 0, 1, 1], [], []>} : vector<8x32xf32>, vector<32x128xf32>, vector<8x128xf32> -> vector<8x128xf32>
    %c0_14 = arith.constant 0 : index
    %c0_15 = arith.constant 0 : index
    %18 = vector.load %arg7[%c0_14, %c0_15] : memref<1x128xf32, #tpu.memory_space<vmem>>, vector<1x128xf32>
    %19 = vector.broadcast %18 : vector<1x128xf32> to vector<8x128xf32>
    %20 = arith.addf %17, %19 : vector<8x128xf32>
    %21 = tpu.concatenate %15, %20 in 1 : vector<8x128xf32>, vector<8x128xf32> -> vector<8x256xf32>
    %22 = arith.mulf %14, %21 : vector<8x256xf32>
    %23 = tpu.concatenate %22, %8 in 1 : vector<8x256xf32>, vector<8x64xf32> -> vector<8x320xf32>
    %c0_16 = arith.constant 0 : index
    %c0_17 = arith.constant 0 : index
    %24 = vector.load %arg8[%c0_16, %c0_17] : memref<320x128xf32, #tpu.memory_space<vmem>>, vector<320x128xf32>
    %cst_18 = arith.constant dense<0.000000e+00> : vector<8x128xf32>
    %25 = tpu.matmul %23, %24, %cst_18 {dimension_numbers = #tpu.dot_dimension_numbers<[1], [0], [0], [1], [0, 0, 1, 1], [], []>} : vector<8x320xf32>, vector<320x128xf32>, vector<8x128xf32> -> vector<8x128xf32>
    %c0_19 = arith.constant 0 : index
    %c0_20 = arith.constant 0 : index
    %26 = vector.load %arg9[%c0_19, %c0_20] : memref<1x128xf32, #tpu.memory_space<vmem>>, vector<1x128xf32>
    %27 = vector.broadcast %26 : vector<1x128xf32> to vector<8x128xf32>
    %28 = arith.addf %25, %27 : vector<8x128xf32>
    %29 = arith.negf %28 : vector<8x128xf32>
    %30 = math.exp %29 : vector<8x128xf32>
    %cst_21 = arith.constant 1.000000e+00 : f32
    %31 = vector.broadcast %cst_21 : f32 to vector<8x128xf32>
    %32 = arith.addf %31, %30 : vector<8x128xf32>
    %33 = arith.divf %31, %32 : vector<8x128xf32>
    %34 = vector.extract_strided_slice %33 {offsets = [0, 0], sizes = [8, 32], strides = [1, 1]} : vector<8x128xf32> to vector<8x32xf32>
    %35 = vector.extract_strided_slice %33 {offsets = [0, 32], sizes = [8, 32], strides = [1, 1]} : vector<8x128xf32> to vector<8x32xf32>
    %36 = vector.extract_strided_slice %33 {offsets = [0, 64], sizes = [8, 32], strides = [1, 1]} : vector<8x128xf32> to vector<8x32xf32>
    %37 = vector.extract_strided_slice %33 {offsets = [0, 96], sizes = [8, 32], strides = [1, 1]} : vector<8x128xf32> to vector<8x32xf32>
    %38 = arith.mulf %34, %37 : vector<8x32xf32>
    %39 = arith.mulf %35, %6 : vector<8x32xf32>
    %40 = arith.addf %38, %39 : vector<8x32xf32>
    %41 = math.tanh %40 : vector<8x32xf32>
    %42 = arith.mulf %36, %41 : vector<8x32xf32>
    %c0_22 = arith.constant 0 : index
    %c0_23 = arith.constant 0 : index
    %43 = vector.load %arg12[%c0_22, %c0_23] : memref<8x32xf32, #tpu.memory_space<vmem>>, vector<8x32xf32>
    tpu.vector_store %arg12[%c0_22, %c0_23], %42 {strides = array<i32>} : memref<8x32xf32, #tpu.memory_space<vmem>>, vector<8x32xf32>,
    %c0_24 = arith.constant 0 : index
    %c0_25 = arith.constant 0 : index
    %44 = vector.load %arg13[%c0_24, %c0_25] : memref<8x32xf32, #tpu.memory_space<vmem>>, vector<8x32xf32>
    tpu.vector_store %arg13[%c0_24, %c0_25], %40 {strides = array<i32>} : memref<8x32xf32, #tpu.memory_space<vmem>>, vector<8x32xf32>,
    %c0_26 = arith.constant 0 : index
    %c0_27 = arith.constant 0 : index
    %c0_28 = arith.constant 0 : index
    %45 = vector.load %arg10[%c0_26, %c0_27, %c0_28] : memref<1x8x32xf32, #tpu.memory_space<vmem>>, vector<1x8x32xf32>
    %46 = vector.shape_cast %45 : vector<1x8x32xf32> to vector<8x32xf32>
    %47 = vector.shape_cast %42 : vector<8x32xf32> to vector<1x8x32xf32>
    tpu.vector_store %arg10[%c0_26, %c0_27, %c0_28], %47 {strides = array<i32>} : memref<1x8x32xf32, #tpu.memory_space<vmem>>, vector<1x8x32xf32>,
    %c0_29 = arith.constant 0 : index
    %c0_30 = arith.constant 0 : index
    %48 = vector.load %arg11[%c0_29, %c0_30] : memref<8x32xf32, #tpu.memory_space<vmem>>, vector<8x32xf32>
    tpu.vector_store %arg11[%c0_29, %c0_30], %40 {strides = array<i32>} : memref<8x32xf32, #tpu.memory_space<vmem>>, vector<8x32xf32>,
    return
  }
  func.func @transform_0(%arg0: i32) -> (i32, i32, i32) {
    %c0_i32 = arith.constant 0 : i32
    %c0_i32_0 = arith.constant 0 : i32
    %c0_i32_1 = arith.constant 0 : i32
    return %arg0, %c0_i32, %c0_i32_0 : i32, i32, i32
  }
  func.func @transform_1(%arg0: i32) -> (i32, i32) {
    %c0_i32 = arith.constant 0 : i32
    %c0_i32_0 = arith.constant 0 : i32
    %c0_i32_1 = arith.constant 0 : i32
    return %c0_i32, %c0_i32_0 : i32, i32
  }
  func.func @transform_2(%arg0: i32) -> (i32, i32) {
    %c0_i32 = arith.constant 0 : i32
    %c0_i32_0 = arith.constant 0 : i32
    %c0_i32_1 = arith.constant 0 : i32
    return %c0_i32, %c0_i32_0 : i32, i32
  }
  func.func @transform_3(%arg0: i32) -> (i32, i32) {
    %c0_i32 = arith.constant 0 : i32
    %c0_i32_0 = arith.constant 0 : i32
    %c0_i32_1 = arith.constant 0 : i32
    return %c0_i32, %c0_i32_0 : i32, i32
  }
  func.func @transform_4(%arg0: i32) -> (i32, i32) {
    %c0_i32 = arith.constant 0 : i32
    %c0_i32_0 = arith.constant 0 : i32
    %c0_i32_1 = arith.constant 0 : i32
    return %c0_i32, %c0_i32_0 : i32, i32
  }
  func.func @transform_5(%arg0: i32) -> (i32, i32) {
    %c0_i32 = arith.constant 0 : i32
    %c0_i32_0 = arith.constant 0 : i32
    %c0_i32_1 = arith.constant 0 : i32
    return %c0_i32, %c0_i32_0 : i32, i32
  }
  func.func @transform_6(%arg0: i32) -> (i32, i32) {
    %c0_i32 = arith.constant 0 : i32
    %c0_i32_0 = arith.constant 0 : i32
    %c0_i32_1 = arith.constant 0 : i32
    return %c0_i32, %c0_i32_0 : i32, i32
  }
  func.func @transform_7(%arg0: i32) -> (i32, i32) {
    %c0_i32 = arith.constant 0 : i32
    %c0_i32_0 = arith.constant 0 : i32
    %c0_i32_1 = arith.constant 0 : i32
    return %c0_i32, %c0_i32_0 : i32, i32
  }
  func.func @transform_8(%arg0: i32) -> (i32, i32) {
    %c0_i32 = arith.constant 0 : i32
    %c0_i32_0 = arith.constant 0 : i32
    %c0_i32_1 = arith.constant 0 : i32
    return %c0_i32, %c0_i32_0 : i32, i32
  }
  func.func @transform_9(%arg0: i32) -> (i32, i32, i32) {
    %c0_i32 = arith.constant 0 : i32
    %c0_i32_0 = arith.constant 0 : i32
    %c0_i32_1 = arith.constant 0 : i32
    return %arg0, %c0_i32, %c0_i32_0 : i32, i32, i32
  }
  func.func @transform_10(%arg0: i32) -> (i32, i32) {
    %c0_i32 = arith.constant 0 : i32
    %c0_i32_0 = arith.constant 0 : i32
    %c0_i32_1 = arith.constant 0 : i32
    return %c0_i32, %c0_i32_0 : i32, i32
  }
}

</mosaic_0001>

<bundles_post_ra>
// kernel: tpu_custom_call.1
= control target key start
LH: loop header
LB: loop body
LE: loop exit
PB: predicated region body
PF: predicated region fallthrough
CT: control target
= control target key end

     0   :  { %16 = vsyncpa [#allocation5], 0  ;;  %s1087_s0 = inlined_call_operand.hbm [shape: f32[1,8,104], index: 0, kind: input, shape index: {}]   ;;  %s1088_s1 = inlined_call_operand.hbm [shape: f32[8,32], index: 1, kind: input, shape index: {}]   ;;  %s1089_s2 = inlined_call_operand.hbm [shape: f32[8,32], index: 2, kind: input, shape index: {}]   ;;  %s1090_s3 = inlined_call_operand.hbm [shape: f32[40,384], index: 3, kind: input, shape index: {}]   ;;  %s1091_s4 = inlined_call_operand.vmem [shape: f32[1,384], index: 4, kind: input, shape index: {}]   ;;  %s1092_s5 = inlined_call_operand.hbm [shape: f32[32,128], index: 5, kind: input, shape index: {}]   ;;  %s1093_s6 = inlined_call_operand.vmem [shape: f32[1,128], index: 6, kind: input, shape index: {}]   ;;  %s1094_s7 = inlined_call_operand.hbm [shape: f32[320,128], index: 7, kind: input, shape index: {}]   ;;  %s1095_s8 = inlined_call_operand.vmem [shape: f32[1,128], index: 8, kind: input, shape index: {}]   ;;  %s1096_s9 = inlined_call_operand.hbm [shape: f32[1,8,32], index: 9, kind: output, shape index: {0}]   ;;  %s1097_s10 = inlined_call_operand.hbm [shape: f32[8,32], index: 10, kind: output, shape index: {1}]  }
   0x1   :  { %17 = vsyncpa [#allocation8], 0 }
   0x2   :  { %18 = vsyncpa [#allocation11], 0 }
   0x3   :  { %19 = vsyncpa [#allocation14], 0 }
   0x4   :  { %20 = vsyncpa [#allocation6], 0 }
   0x5   :  { %21 = vsyncpa [#allocation17], 0  ;;  %s948_s13 = smov [#allocation7]   ;;  %s949_s15 = smov [#allocation10]  }
   0x6   :  { %s38_s14 = sshll.u32 %s948_s13, 4  ;;  %s57_s16 = sshll.u32 %s949_s15, 4  ;;  %s39_s14 = int_to_ptr.vmem [resolvable:$true] %s38_s14  ;;  %s58_s16 = int_to_ptr.vmem [resolvable:$true] %s57_s16 }
   0x7   :  { %s784_s17 = scalar_lea.vmem %s39_s14, 128  ;;  %p789_p1 = scmp.lt.s32.totalorder %s39_s14, %s39_s14 }
   0x8   :  { %p785_p0 = scmp.ne.s32.totalorder %s39_s14, %s784_s17  ;;  %p790_p2 = scmp.lt.s32.totalorder %s784_s17, %s784_s17 }
   0xa   :  { %p791_p3 = por %p790_p2, %p789_p1 }
   0xc   :  { %p792_p4 = pnand %p791_p3, %p785_p0 }
   0xe   :  { %795 = shalt.err (!%p792_p4)
}
   0xf   :  { %41 = dma.hbm_to_vmem [thread:$0]  %s1088_s1, 128, %s39_s14, [#allocation8]  }
  0x10   :  { %s804_s20 = scalar_lea.vmem %s58_s16, 1920  ;;  %p809_p6 = scmp.lt.s32.totalorder %s58_s16, %s58_s16 }
  0x11   :  { %p805_p5 = scmp.ne.s32.totalorder %s58_s16, %s804_s20  ;;  %p810_p7 = scmp.lt.s32.totalorder %s804_s20, %s804_s20 }
  0x13   :  { %p811_p8 = por %p810_p7, %p809_p6 }
  0x15   :  { %p812_p9 = pnand %p811_p8, %p805_p5 }
  0x17   :  { %815 = shalt.err (!%p812_p9)
}
  0x18   :  { %s950_s21 = smov 384   ;;  %s951_s22 = smov 24  }
  0x19   :  { %63 = dma.hbm_to_vmem [thread:$0]  %s1090_s3, 1920, %s58_s16, [#allocation11], %s950_s21, %s950_s21, %s951_s22  }
  0x1a   :  { %s952_s25 = smov [#allocation4]   ;;  %s953_s27 = smov [#allocation9]  }
  0x1b   :  { %s28_s26 = sshll.u32 %s952_s25, 4  ;;  %s48_s28 = sshll.u32 %s953_s27, 4  ;;  %s29_s26 = int_to_ptr.vmem [resolvable:$true] %s28_s26  ;;  %s49_s28 = int_to_ptr.vmem [resolvable:$true] %s48_s28 }
  0x1c   :  { %s824_s1 = scalar_lea.vmem %s29_s26, 128  ;;  %p829_p11 = scmp.lt.s32.totalorder %s29_s26, %s29_s26 }
  0x1d   :  { %p825_p10 = scmp.ne.s32.totalorder %s29_s26, %s824_s1  ;;  %p830_p12 = scmp.lt.s32.totalorder %s824_s1, %s824_s1 }
  0x1f   :  { %p831_p13 = por %p830_p12, %p829_p11 }
  0x21   :  { %p832_p0 = pnand %p831_p13, %p825_p10 }
  0x23   :  { %835 = shalt.err (!%p832_p0)
}
  0x24   :  { %31 = dma.hbm_to_vmem [thread:$0]  %s1087_s0, 128, %s29_s26, [#allocation5]  }
  0x25   :  { %s844_s11 = scalar_lea.vmem %s49_s28, 128  ;;  %p849_p2 = scmp.lt.s32.totalorder %s49_s28, %s49_s28 }
  0x26   :  { %p845_p1 = scmp.ne.s32.totalorder %s49_s28, %s844_s11  ;;  %p850_p3 = scmp.lt.s32.totalorder %s844_s11, %s844_s11 }
  0x28   :  { %p851_p4 = por %p850_p3, %p849_p2 }
  0x2a   :  { %p852_p5 = pnand %p851_p4, %p845_p1 }
  0x2c   :  { %855 = shalt.err (!%p852_p5)
}
  0x2d   :  { %51 = dma.hbm_to_vmem [thread:$0]  %s1089_s2, 128, %s49_s28, [#allocation8]  }
  0x2e   :  { %s954_s13 = smov [#allocation12]  }
  0x2f   :  { %s71_s14 = sshll.u32 %s954_s13, 4  ;;  %s72_s14 = int_to_ptr.vmem [resolvable:$true] %s71_s14 }
  0x30   :  { %s864_s15 = scalar_lea.vmem %s72_s14, 512  ;;  %p869_p7 = scmp.lt.s32.totalorder %s72_s14, %s72_s14 }
  0x31   :  { %p865_p6 = scmp.ne.s32.totalorder %s72_s14, %s864_s15  ;;  %p870_p8 = scmp.lt.s32.totalorder %s864_s15, %s864_s15 }
  0x33   :  { %p871_p9 = por %p870_p8, %p869_p7 }
  0x35   :  { %p872_p10 = pnand %p871_p9, %p865_p6 }
  0x37   :  { %875 = shalt.err (!%p872_p10)
}
  0x38   :  { %s955_s0 = smov 128   ;;  %s956_s16 = smov 8  }
  0x39   :  { %77 = dma.hbm_to_vmem [thread:$0]  %s1092_s5, 512, %s72_s14, [#allocation11], %s955_s0, %s955_s0, %s956_s16  }
  0x3a   :  { %s957_s19 = smov [#allocation13]  }
  0x3b   :  { %s85_s20 = sshll.u32 %s957_s19, 4  ;;  %s86_s20 = int_to_ptr.vmem [resolvable:$true] %s85_s20 }
  0x3c   :  { %s884_s2 = scalar_lea.vmem %s86_s20, 5120  ;;  %p889_p12 = scmp.lt.s32.totalorder %s86_s20, %s86_s20 }
  0x3d   :  { %p885_p11 = scmp.ne.s32.totalorder %s86_s20, %s884_s2  ;;  %p890_p13 = scmp.lt.s32.totalorder %s884_s2, %s884_s2 }
  0x3f   :  { %p891_p0 = por %p890_p13, %p889_p12 }
  0x41   :  { %p892_p1 = pnand %p891_p0, %p885_p11 }
  0x43   :  { %895 = shalt.err (!%p892_p1)
}
  0x44   :  { %91 = dma.hbm_to_vmem [thread:$0]  %s1094_s7, 5120, %s86_s20, [#allocation14], %s955_s0, %s955_s0, %s956_s16  }
  0x45   :  { %936 = dma.done.wait [#allocation5], 128  }
  0x46   :  { %937 = vsyncadd [#allocation5], 4294967168 }
  0x47   :  { %938 = dma.done.wait [#allocation8], 256  }
  0x48   :  { %939 = vsyncadd [#allocation8], 4294967040 }
  0x49   :  { %940 = dma.done.wait [#allocation11], 2432  }
  0x4a   :  { %941 = vsyncadd [#allocation11], 4294964864 }
  0x4b   :  { %942 = dma.done.wait [#allocation14], 5120  }
  0x4c   :  { %943 = vsyncadd [#allocation14], 4294962176  ;;  %v958_v0 = vmov 0.0   ;;  %vm959_vm0 = vmmov 0   ;;  %v137_v1 = vld [vmem:[#allocation10 + $0x68] sm:$0xff]  ;;  %v136_v2 = vld [vmem:[#allocation10 + $0x60] sm:$0xff] }
  0x4d   :  { %709 = vmatprep.subr.mxu1 %v958_v0  ;;  %224 = vmatprep.mubr.f32.mxu0 %v958_v0  ;;  %v134_v3 = vld [vmem:[#allocation10 + $0x50] sm:$0xff]  ;;  %v133_v5 = vld [vmem:[#allocation10 + $0x48] sm:$0xff]  ;;  %v131_v6 = vld [vmem:[#allocation10 + $0x38] sm:$0xff]  ;;  %vm117_vm1 = vcmask 261120   ;;  %vm156_vm2 = vcmask 326656   ;;  %s960_s5 = smov 88  }
  0x4e   :  { %719 = vmatprep.mubr.msk.f32.mxu1 %vm959_vm0, %v958_v0  ;;  %182 = vmatprep.subr.mxu0 %v137_v1  ;;  %v138_v4 = vld [vmem:[#allocation10 + $0x70] sm:$0xff]  ;;  %v135_v7 = vld [vmem:[#allocation10 + $0x58] sm:$0xff]  ;;  %v132_v9 = vld [vmem:[#allocation10 + $0x40] sm:$0xff]  ;;  %s961_s7 = smov 32   ;;  %vm437_vm3 = vcmask 523264   ;;  %s964_s28 = smov [#allocation16]  }
  0x4f   :  { %183 = vmatpush1.msra.mxu0 %v136_v2  ;;  %710 = vmatpush3.msra.mxu1 %v138_v4  ;;  %v130_v8 = vld [vmem:[#allocation10 + $0x30] sm:$0xff]  ;;  %v128_v10 = vld [vmem:[#allocation10 + $0x20] sm:$0xff]  ;;  %v127_v11 = vld [vmem:[#allocation10 + $0x18] sm:$0xff]  ;;  %s631_s1 = sshll.u32 %s964_s28, 4  ;;  %s632_s1 = int_to_ptr.vmem [resolvable:$true] %s631_s1 }
  0x50   :  { %184 = vmatprep.subr.mxu0 %v134_v3  ;;  %711 = vmatprep.subr.mxu1 %v958_v0  ;;  %v129_v12 = vld [vmem:[#allocation10 + $0x28] sm:$0xff]  ;;  %v116_v14 = vld [vmem:[#allocation7] sm:$0xff]  ;;  %v124_v15 = vld [vmem:[#allocation10] sm:$0xff]  ;;  %v141_v3 = vlaneseq  ;;  %s896_s29 = scalar_lea.vmem %s632_s1, 128  ;;  %p901_p3 = scmp.lt.s32.totalorder %s632_s1, %s632_s1 }
  0x51   :  { %185 = vmatpush1.msra.mxu0 %v133_v5  ;;  %712 = vmatpush3.msra.mxu1 %v135_v7  ;;  %v125_v13 = vld [vmem:[#allocation10 + $0x8] sm:$0xff]  ;;  %v126_v16 = vld [vmem:[#allocation10 + $0x10] sm:$0xff]  ;;  %118 = vst.msk [vmem:[#allocation2] sm:$0xff] %vm117_vm1, %v116_v14  ;;  %v119_v17 = vld [vmem:[#allocation9] sm:$0xff]  ;;  %p897_p2 = scmp.ne.s32.totalorder %s632_s1, %s896_s29  ;;  %p902_p4 = scmp.lt.s32.totalorder %s896_s29, %s896_s29 }
  0x52   :  { %186 = vmatprep.subr.mxu0 %v131_v6  ;;  %713 = vmatprep.subr.mxu1 %v958_v0  ;;  %v121_v18 = vld [vmem:[#allocation4] sm:$0xff]  ;;  %120 = vst.msk [vmem:[#allocation3] sm:$0xff] %vm117_vm1, %v119_v17  ;;  %v304_v19 = vld [vmem:[#allocation12 + $0x18] sm:$0xff]  ;;  %v302_v22 = vld [vmem:[#allocation12 + $0x8] sm:$0xff]  ;;  %v142_v4 = vshrl.u32 %v141_v3, 7 }
  0x53   :  { %187 = vmatpush1.msra.mxu0 %v130_v8  ;;  %714 = vmatpush3.msra.mxu1 %v132_v9  ;;  %v303_v20 = vld [vmem:[#allocation12 + $0x10] sm:$0xff]  ;;  %v421_v21 = vld [vmem:[#allocation13 + $0xf8] sm:$0xff]  ;;  %v301_v25 = vld [vmem:[#allocation12] sm:$0xff]  ;;  %p903_p5 = por %p902_p4, %p901_p3 }
  0x54   :  { %188 = vmatprep.subr.mxu0 %v128_v10  ;;  %715 = vmatprep.subr.mxu1 %v958_v0  ;;  %v405_v23 = vld [vmem:[#allocation13 + $0x78] sm:$0xff]  ;;  %v420_v24 = vld [vmem:[#allocation13 + $0xf0] sm:$0xff]  ;;  %v419_v28 = vld [vmem:[#allocation13 + $0xe8] sm:$0xff]  ;;  %v143_v5 = vsub.s32 0, %v142_v4  ;;  %v151_v6 = vsub.s32 2, %v142_v4  ;;  %v147_v9 = vsub.s32 1, %v142_v4 }
  0x55   :  { %189 = vmatpush1.msra.mxu0 %v127_v11  ;;  %716 = vmatpush3.msra.mxu1 %v129_v12  ;;  %v404_v26 = vld [vmem:[#allocation13 + $0x70] sm:$0xff]  ;;  %v403_v29 = vld [vmem:[#allocation13 + $0x68] sm:$0xff]  ;;  %v418_v30 = vld [vmem:[#allocation13 + $0xe0] sm:$0xff]  ;;  %p904_p6 = pnand %p903_p5, %p897_p2 }
  0x56   :  { %190 = vmatprep.subr.mxu0 %v125_v13  ;;  %717 = vmatprep.subr.mxu1 %v958_v0  ;;  %v402_v31 = vld [vmem:[#allocation13 + $0x60] sm:$0xff]  ;;  %v417_v32 = vld [vmem:[#allocation13 + $0xd8] sm:$0xff]  ;;  %v416_v34 = vld [vmem:[#allocation13 + $0xd0] sm:$0xff] }
  0x57   :  { %191 = vmatpush1.msra.mxu0 %v124_v15  ;;  %718 = vmatpush3.msra.mxu1 %v126_v16  ;;  %v401_v33 = vld [vmem:[#allocation13 + $0x58] sm:$0xff]  ;;  %v400_v35 = vld [vmem:[#allocation13 + $0x50] sm:$0xff]  ;;  %v415_v36 = vld [vmem:[#allocation13 + $0xc8] sm:$0xff] }
  0x58   :  { %647 = vmatmul.mubr.msk.f32.vlgmr.msra.gmra.mxu0 %vm156_vm2, %v121_v18  ;;  %722 = vmatprep.subr.mxu0 %v958_v0  ;;  %v122_v27 = vld [vmem:[#allocation2] sm:$0xff]  ;;  %v399_v37 = vld [vmem:[#allocation13 + $0x48] sm:$0xff]  ;;  %v413_v40 = vld [vmem:[#allocation13 + $0xb8] sm:$0xff] }
  0x59   :  { %720 = vmatmul.mubr.msk.f32.vlgmr.msra.gmra.mxu1 %vm156_vm2, %v121_v18  ;;  %723 = vmatpush3.msra.mxu0 %v304_v19  ;;  %v414_v38 = vld [vmem:[#allocation13 + $0xc0] sm:$0xff]  ;;  %v397_v41 = vld [vmem:[#allocation13 + $0x38] sm:$0xff]  ;;  %v412_v42 = vld [vmem:[#allocation13 + $0xb0] sm:$0xff] }
  0x5a   :  { %724 = vmatprep.subr.mxu0 %v958_v0  ;;  %730 = vmatprep.mubr.msk.f32.mxu0 %vm959_vm0, %v958_v0  ;;  %v398_v39 = vld [vmem:[#allocation13 + $0x40] sm:$0xff]  ;;  %v396_v43 = vld [vmem:[#allocation13 + $0x30] sm:$0xff]  ;;  %v411_v44 = vld [vmem:[#allocation13 + $0xa8] sm:$0xff] }
  0x5b   :  { %725 = vmatpush3.msra.mxu0 %v303_v20  ;;  %388 = vrot.lane.b32.xlu0 %v121_v18, %s960_s5  ;;  %v395_v45 = vld [vmem:[#allocation13 + $0x28] sm:$0xff]  ;;  %v429_v46 = vld [vmem:[#allocation13 + $0x138] sm:$0xff]  ;;  %v410_v47 = vld [vmem:[#allocation13 + $0xa0] sm:$0xff] }
  0x5c   :  { %726 = vmatprep.subr.mxu0 %v958_v0  ;;  %665 = vmatprep.subr.mxu1 %v421_v21  ;;  %v394_v48 = vld [vmem:[#allocation13 + $0x20] sm:$0xff]  ;;  %v428_v49 = vld [vmem:[#allocation13 + $0x130] sm:$0xff]  ;;  %v409_v50 = vld [vmem:[#allocation13 + $0x98] sm:$0xff] }
  0x5d   :  { %727 = vmatpush3.msra.mxu0 %v302_v22  ;;  %666 = vmatpush3.msra.mxu1 %v405_v23  ;;  %v393_v51 = vld [vmem:[#allocation13 + $0x18] sm:$0xff]  ;;  %v427_v52 = vld [vmem:[#allocation13 + $0x128] sm:$0xff]  ;;  %v408_v53 = vld [vmem:[#allocation13 + $0x90] sm:$0xff] }
  0x5e   :  { %728 = vmatprep.subr.mxu0 %v958_v0  ;;  %667 = vmatprep.subr.mxu1 %v420_v24  ;;  %v392_v54 = vld [vmem:[#allocation13 + $0x10] sm:$0xff]  ;;  %v426_v55 = vld [vmem:[#allocation13 + $0x120] sm:$0xff]  ;;  %v407_v56 = vld [vmem:[#allocation13 + $0x88] sm:$0xff] }
  0x5f   :  { %729 = vmatpush3.msra.mxu0 %v301_v25  ;;  %668 = vmatpush3.msra.mxu1 %v404_v26  ;;  %v391_v57 = vld [vmem:[#allocation13 + $0x8] sm:$0xff]  ;;  %v425_v58 = vld [vmem:[#allocation13 + $0x118] sm:$0xff]  ;;  %v406_v59 = vld [vmem:[#allocation13 + $0x80] sm:$0xff] }
  0x60   :  { %731 = vmatmul.mubr.msk.f32.vlgmr.msra.gmra.mxu0 %vm117_vm1, %v122_v27  ;;  %669 = vmatprep.subr.mxu1 %v419_v28  ;;  %v390_v60 = vld [vmem:[#allocation13] sm:$0xff]  ;;  %v424_v61 = vld [vmem:[#allocation13 + $0x110] sm:$0xff]  ;;  %v423_v62 = vld [vmem:[#allocation13 + $0x108] sm:$0xff] }
  0x61   :  { %670 = vmatpush3.msra.mxu1 %v403_v29  ;;  %733 = vmatprep.subr.mxu0 %v958_v0  ;;  %v422_v63 = vld [vmem:[#allocation13 + $0x100] sm:$0xff]  ;;  %v123_v1 = vld [vmem:[#allocation3] sm:$0xff] }
  0x62   :  { %671 = vmatprep.subr.mxu1 %v418_v30  ;;  %749 = vmatprep.mubr.msk.f32.mxu0 %vm959_vm0, %v958_v0  ;;  %v139_v7 = vld [vmem:[%s1091_s4] sm:$0x7] }
  0x63   :  { %672 = vmatpush3.msra.mxu1 %v402_v31  ;;  %734 = vmatpush3.msra.mxu0 %v429_v46  ;;  %v144_v12 = vrot.slane %v139_v7, %v143_v5  ;;  %v152_v13 = vrot.slane %v139_v7, %v151_v6  ;;  %v148_v14 = vrot.slane %v139_v7, %v147_v9  ;;  %v649_v15 = vld [vmem:[%s1093_s6] ss:$0 sm:$0xff]  ;;  %s962_s6 = smov 96  }
  0x64   :  { %673 = vmatprep.subr.mxu1 %v417_v32  ;;  %735 = vmatprep.subr.mxu0 %v958_v0  ;;  %v651_v28 = vld [vmem:[%s1095_s8] ss:$0 sm:$0xff]  ;;  %s963_s8 = smov 64  }
  0x65   :  { %674 = vmatpush3.msra.mxu1 %v401_v33  ;;  %736 = vmatpush3.msra.mxu0 %v428_v49 }
  0x66   :  { %675 = vmatprep.subr.mxu1 %v416_v34  ;;  %737 = vmatprep.subr.mxu0 %v958_v0 }
  0x67   :  { %676 = vmatpush3.msra.mxu1 %v400_v35  ;;  %738 = vmatpush3.msra.mxu0 %v427_v52 }
  0x68   :  { %677 = vmatprep.subr.mxu1 %v415_v36  ;;  %739 = vmatprep.subr.mxu0 %v958_v0 }
  0x69   :  { %678 = vmatpush3.msra.mxu1 %v399_v37  ;;  %740 = vmatpush3.msra.mxu0 %v426_v55 }
  0x6a   :  { %679 = vmatprep.subr.mxu1 %v414_v38  ;;  %741 = vmatprep.subr.mxu0 %v958_v0 }
  0x6b   :  { %680 = vmatpush3.msra.mxu1 %v398_v39  ;;  %742 = vmatpush3.msra.mxu0 %v425_v58 }
  0x6c   :  { %681 = vmatprep.subr.mxu1 %v413_v40  ;;  %743 = vmatprep.subr.mxu0 %v958_v0 }
  0x6d   :  { %682 = vmatpush3.msra.mxu1 %v397_v41  ;;  %744 = vmatpush3.msra.mxu0 %v424_v61 }
  0x6e   :  { %683 = vmatprep.subr.mxu1 %v412_v42  ;;  %745 = vmatprep.subr.mxu0 %v958_v0 }
  0x6f   :  { %684 = vmatpush3.msra.mxu1 %v396_v43  ;;  %746 = vmatpush3.msra.mxu0 %v423_v62 }
  0x70   :  { %685 = vmatprep.subr.mxu1 %v411_v44  ;;  %592 = vrot.lane.b32.xlu0 %v123_v1, %s961_s7 }
  0x71   :  { %686 = vmatpush3.msra.mxu1 %v395_v45  ;;  %747 = vmatprep.subr.mxu0 %v958_v0 }
  0x72   :  { %687 = vmatprep.subr.mxu1 %v410_v47  ;;  %748 = vmatpush3.msra.mxu0 %v422_v63 }
  0x73   :  { %688 = vmatpush3.msra.mxu1 %v394_v48 }
  0x74   :  { %689 = vmatprep.subr.mxu1 %v409_v50 }
  0x75   :  { %690 = vmatpush3.msra.mxu1 %v393_v51 }
  0x76   :  { %691 = vmatprep.subr.mxu1 %v408_v53 }
  0x77   :  { %692 = vmatpush3.msra.mxu1 %v392_v54 }
  0x78   :  { %693 = vmatprep.subr.mxu1 %v407_v56 }
  0x79   :  { %694 = vmatpush3.msra.mxu1 %v391_v57 }
  0x7a   :  { %695 = vmatprep.subr.mxu1 %v406_v59 }
  0x7b   :  { %696 = vmatpush3.msra.mxu1 %v390_v60 }
  0xcd   :  { %v389_v2 = vpop.permute.xlu0 %388 }
  0xce   :  { %750 = vmatmul.mubr.msk.f32.vlgmr.msra.gmra.mxu0 %vm437_vm3, %v389_v2 }
  0xe2   :  { %v593_v36 = vpop.permute.xlu0 %592 }
 0x118   :  { %v226_v10 = vpop.f32.mrf.mxu0 }
 0x119   :  { %v297_v8 = vpop.f32.mrf.mxu1  ;;  %v227_v16 = vadd.f32 %v226_v10, %v144_v12 }
 0x11a   :  { %v228_v0 = vpop.f32.mrf.mxu0  ;;  %v298_v17 = vadd.f32 %v297_v8, %v152_v13 }
 0x11b   :  { %v721_v11 = vpop.f32.mrf.mxu1  ;;  %v229_v19 = vadd.f32 %v228_v0, %v148_v14 }
 0x11c   :  { %v386_v23 = vmul.f32 %v298_v17, %v227_v16 }
 0x120   :  { %v382_v18 = vpop.f32.mrf.mxu0 }
 0x121   :  { %v383_v20 = vadd.f32 %v649_v15, %v382_v18 }
 0x122   :  { %v732_v21 = vpop.f32.mrf.mxu0 }
 0x123   :  { %v387_v22 = vmul.f32 %v383_v20, %v229_v19 }
 0x125   :  { %504 = vmatprep.mubr.f32.mxu1 %v387_v22 }
 0x126   :  { %505 = vmatmul.mubr.f32.vlgmr.msra.gmra.mxu1 %v386_v23 }
 0x18e   :  { %v576_v24 = vpop.f32.mrf.mxu0 }
 0x190   :  { %v751_v25 = vpop.f32.mrf.mxu0 }
 0x1e6   :  { %v697_v26 = vpop.f32.mrf.mxu1 }
 0x1e8   :  { %v698_v27 = vpop.f32.mrf.mxu1 }
 0x1e9   :  { %v699_v29 = vadd.f32 %v698_v27, %v697_v26 }
 0x1eb   :  { %v507_v30 = vadd.f32 %v699_v29, %v651_v28 }
 0x1ed   :  { %v577_v31 = vadd.f32 %v576_v24, %v507_v30 }
 0x1ef   :  { %v653_v32 = vmul.f32 -1.442695, %v577_v31 }
 0x1f1   :  { %770 = vpow2.f32 %v653_v32 }
 0x1fe   :  { %v771_v33 = vpop.eup %770 }
 0x1ff   :  { %v583_v34 = vadd.f32 1.0, %v771_v33 }
 0x201   :  { %772 = vrcp.f32 %v583_v34 }
 0x20e   :  { %v773_v35 = vpop.eup %772 }
 0x20f   :  { %587 = vrot.lane.b32.xlu1 %v773_v35, %s961_s7  ;;  %v595_v37 = vmul.f32 %v773_v35, %v593_v36 }
 0x213   :  { %597 = vrot.lane.b32.xlu1 %v595_v37, %s962_s6 }
 0x281   :  { %v588_v38 = vpop.permute.xlu1 %587 }
 0x282   :  { %v590_v39 = vmul.f32 %v773_v35, %v588_v38 }
 0x285   :  { %v598_v40 = vpop.permute.xlu1 %597 }
 0x286   :  { %v600_v41 = vadd.f32 %v598_v40, %v590_v39 }
 0x288   :  { %774 = vtanh.f32 %v600_v41  ;;  %612 = vst.msk [vmem:[#allocation3] sm:$0xff] %vm117_vm1, %v600_v41  ;;  %614 = vst.msk [vmem:[#allocation16] sm:$0xff] %vm117_vm1, %v600_v41 }
 0x295   :  { %v775_v42 = vpop.eup %774 }
 0x296   :  { %603 = vrot.lane.b32.xlu0 %v775_v42, %s963_s8 }
 0x297   :  { %907 = shalt.err (!%p904_p6)
}
 0x298   :  { %634 = dma.vmem_to_hbm [thread:$0]  %s632_s1, 128, %s1097_s10, [#allocation17]  }
 0x299   :  { %s965_s3 = smov [#allocation15]  }
 0x29a   :  { %s621_s12 = sshll.u32 %s965_s3, 4  ;;  %s622_s12 = int_to_ptr.vmem [resolvable:$true] %s621_s12 }
 0x29b   :  { %s916_s13 = scalar_lea.vmem %s622_s12, 128  ;;  %p921_p8 = scmp.lt.s32.totalorder %s622_s12, %s622_s12 }
 0x29c   :  { %p917_p7 = scmp.ne.s32.totalorder %s622_s12, %s916_s13  ;;  %p922_p9 = scmp.lt.s32.totalorder %s916_s13, %s916_s13 }
 0x29e   :  { %p923_p10 = por %p922_p9, %p921_p8 }
 0x2a0   :  { %p924_p11 = pnand %p923_p10, %p917_p7 }
 0x308   :  { %v604_v43 = vpop.permute.xlu0 %603 }
 0x309   :  { %v606_v44 = vmul.f32 %v773_v35, %v604_v43 }
 0x30b   :  { %608 = vrot.lane.b32.xlu1 %v606_v44, %s963_s8 }
 0x37d   :  { %v609_v45 = vpop.permute.xlu1 %608 }
 0x37e   :  { %611 = vst.msk [vmem:[#allocation2] sm:$0xff] %vm117_vm1, %v609_v45  ;;  %613 = vst.msk [vmem:[#allocation15] sm:$0xff] %vm117_vm1, %v609_v45 }
 0x37f   :  { %927 = shalt.err (!%p924_p11)
}
 0x380   :  { %624 = dma.vmem_to_hbm [thread:$0]  %s622_s12, 128, %s1096_s9, [#allocation6]  }
 0x381   :  { %944 = dma.done.wait [#allocation6], 128  }
 0x382   :  { %945 = vsyncadd [#allocation6], 4294967168 }
 0x383   :  { %946 = dma.done.wait [#allocation17], 128  }
 0x384   :  { %947 = vsyncadd [#allocation17], 4294967168 }
 0x385   :  { %641 = vsyncpa [#allocation5], 1 }
 0x386   :  { %642 = vsyncpa [#allocation8], 1 }
 0x387   :  { %643 = vsyncpa [#allocation11], 1 }
 0x388   :  { %644 = vsyncpa [#allocation14], 1 }
 0x389   :  { %645 = vsyncpa [#allocation6], 1 }
 0x38a   :  { %646 = vsyncpa [#allocation17], 1 }

</bundles_post_ra>
